<compile_context>
chip_gen: v6e
topology: v6e:2x2x1
jax: 0.10.0
libtpu: 0.0.40
codegen_flags: <defaults>
</compile_context>

<pallas_src>
import math
import functools

import jax
import jax.numpy as jnp
from jax.experimental import pallas as pl
from jax.experimental.pallas import tpu as pltpu


# ----------------------------- config -----------------------------
class Config:
    d_model = 32
    n_heads = 4
    d_k = 8
    d_ff = 64


# ----------------------------- kernel -----------------------------
def encoder_layer_kernel(
    x_ref, mask_ref,
    wqkv_ref, bqkv_ref,          # [D, 3*H*dk] bf16, [1, 3*H*dk] f32   (Q|K|V packed on lanes)
    wo_ref, bo_ref,              # [H*dk, D]  bf16, [1, D]  f32
    w1_ref, b1_ref,              # [D, dff]   bf16, [1, dff] f32
    w2_ref, b2_ref,              # [dff, D]   bf16, [1, D]  f32
    o_ref,                       # [1, S, D]
    *, seq_len, n_heads, d_k,
):
    S, H, dk = seq_len, n_heads, d_k
    Hdk = H * dk

    x = x_ref[0].astype(jnp.bfloat16)          # [S, D]   bf16 MXU operand
    mask = mask_ref[0]                         # [S, S]   f32 (>0 means masked)

    # ---- fused QKV projection: single lane-dense matmul, f32 accumulation ----
    qkv = jnp.dot(x, wqkv_ref[...], preferred_element_type=jnp.float32)
    qkv = qkv + bqkv_ref[...]                                          # [S, 3*H*dk]
    q, k, v = qkv[:, :Hdk], qkv[:, Hdk:2 * Hdk], qkv[:, 2 * Hdk:]      # [S, H*dk] each

    # ---- head split: static lane slices + leading-axis stack (cheap XLU) ----
    def split_heads(t):                         # [S, H*dk] -> [H, S, dk]
        return jnp.stack([t[:, h * dk:(h + 1) * dk] for h in range(H)], axis=0)

    qh = split_heads(q).astype(jnp.bfloat16)
    kh = split_heads(k).astype(jnp.bfloat16)
    vh = split_heads(v).astype(jnp.bfloat16)

    # ---- scaled dot-product attention, batched over heads ----
    inv_scale = 1.0 / math.sqrt(float(dk))
    s = jnp.einsum('hqd,hkd->hqk', qh, kh,
                   preferred_element_type=jnp.float32) * inv_scale     # [H, S, S]
    # masked_fill_(-1e9): broadcast the [S,S] mask over heads, no concat/copy.
    s = jnp.where(mask[None, :, :] > 0.0, -1e9, s)
    s = s - jnp.max(s, axis=-1, keepdims=True)                         # stable softmax
    p = jnp.exp(s)
    p = p * pl.reciprocal(jnp.sum(p, axis=-1, keepdims=True), approx=True)
    ctx = jnp.einsum('hqk,hkd->hqd', p.astype(jnp.bfloat16), vh,
                     preferred_element_type=jnp.float32)               # [H, S, dk]

    # ---- output projection: re-pack heads on lanes, ONE lane-dense matmul ----
    ctx2 = jnp.concatenate([ctx[h] for h in range(H)], axis=-1)        # [S, H*dk]
    attn_out = jnp.dot(ctx2.astype(jnp.bfloat16), wo_ref[...],
                       preferred_element_type=jnp.float32) + bo_ref[...]   # [S, D]

    # ---- position-wise FFN with erf-based gelu (elementwise kept in f32) ----
    h1 = jnp.dot(attn_out.astype(jnp.bfloat16), w1_ref[...],
                 preferred_element_type=jnp.float32) + b1_ref[...]     # [S, dff]
    g = h1 * 0.5 * (1.0 + jax.lax.erf(h1 * (1.0 / math.sqrt(2.0))))
    out = jnp.dot(g.astype(jnp.bfloat16), w2_ref[...],
                  preferred_element_type=jnp.float32) + b2_ref[...]    # [S, D]

    o_ref[0] = out.astype(o_ref.dtype)


# ----------------------------- wrapper -----------------------------
def encoder_layer(x, attn_mask, params, config):
    """x: [B, S, d_model] float32; attn_mask: [B, S, S] (bool or {0,1})."""
    B, S, D = x.shape
    H, dk, dff = config.n_heads, config.d_k, config.d_ff
    Hdk = H * dk

    mask_f = attn_mask.astype(jnp.float32)

    # Host-side packing (free): Q|K|V weights concatenated lane-wise so the
    # kernel runs one [S, D] x [D, 3*H*dk] matmul. Weights cast to bf16 once
    # (halves HBM->VMEM traffic); biases stay f32 (added post-accumulation).
    wqkv = jnp.concatenate([params["wq"], params["wk"], params["wv"]],
                           axis=-1).astype(jnp.bfloat16)               # [D, 3*H*dk]
    bqkv = jnp.concatenate([params["bq"], params["bk"], params["bv"]], axis=-1)  # [1, 3*H*dk]
    wo = params["wo"].astype(jnp.bfloat16)                             # [H*dk, D]
    w1 = params["w1"].astype(jnp.bfloat16)                             # [D, dff]
    w2 = params["w2"].astype(jnp.bfloat16)                             # [dff, D]

    kernel = functools.partial(encoder_layer_kernel,
                               seq_len=S, n_heads=H, d_k=dk)

    batch_map = lambda b: (b, 0, 0)   # per-batch activation / mask / output tiles
    const_map = lambda b: (0, 0)      # weights resident in VMEM (no re-DMA per step)

    out = pl.pallas_call(
        kernel,
        out_shape=jax.ShapeDtypeStruct((B, S, D), x.dtype),
        # Grid over batch: each step is a self-contained attention row tile.
        # "parallel" lets v7x shard the axis across its two TensorCores.
        grid=(B,),
        in_specs=[
            pl.BlockSpec((1, S, D), batch_map),      # x
            pl.BlockSpec((1, S, S), batch_map),      # mask
            pl.BlockSpec((D, 3 * Hdk), const_map),   # wqkv
            pl.BlockSpec((1, 3 * Hdk), const_map),   # bqkv
            pl.BlockSpec((Hdk, D), const_map),       # wo
            pl.BlockSpec((1, D), const_map),         # bo
            pl.BlockSpec((D, dff), const_map),       # w1
            pl.BlockSpec((1, dff), const_map),       # b1
            pl.BlockSpec((dff, D), const_map),       # w2
            pl.BlockSpec((1, D), const_map),         # b2
        ],
        out_specs=pl.BlockSpec((1, S, D), batch_map),
        compiler_params=pltpu.CompilerParams(
            dimension_semantics=("parallel",),
            vmem_limit_bytes=64 * 1024 * 1024,
        ),
    )(x, mask_f, wqkv, bqkv, wo, params["bo"], w1, params["b1"], w2, params["b2"])

    return out


# --------------------- pure-JAX reference (check) ---------------------
def encoder_layer_ref(x, attn_mask, params, config):
    H, dk = config.n_heads, config.d_k
    B, S, D = x.shape
    q = x @ params["wq"] + params["bq"][0]
    k = x @ params["wk"] + params["bk"][0]
    v = x @ params["wv"] + params["bv"][0]
    q = q.reshape(B, S, H, dk).transpose(0, 2, 1, 3)
    k = k.reshape(B, S, H, dk).transpose(0, 2, 1, 3)
    v = v.reshape(B, S, H, dk).transpose(0, 2, 1, 3)
    scores = jnp.einsum("bhqd,bhkd->bhqk", q, k) / math.sqrt(dk)
    mask = attn_mask[:, None, :, :].astype(bool)
    scores = jnp.where(mask, -1e9, scores)
    attn = jax.nn.softmax(scores, axis=-1)
    ctx = jnp.einsum("bhqk,bhkd->bhqd", attn, v).transpose(0, 2, 1, 3).reshape(B, S, H * dk)
    attn_out = ctx @ params["wo"] + params["bo"][0]
    h1 = attn_out @ params["w1"] + params["b1"][0]
    g = h1 * 0.5 * (1.0 + jax.lax.erf(h1 / math.sqrt(2.0)))
    return g @ params["w2"] + params["b2"][0]


# ----------------------------- main -----------------------------
if __name__ == "__main__":
    cfg = Config()
    B, S, D, H, dk, dff = 2, 8, cfg.d_model, cfg.n_heads, cfg.d_k, cfg.d_ff

    key = jax.random.PRNGKey(0)
    keys = jax.random.split(key, 16)

    def init(k, shape, scale=0.1):
        return (scale * jax.random.normal(k, shape)).astype(jnp.float32)

    params = {
        "wq": init(keys[0], (D, H * dk)), "bq": init(keys[1], (1, H * dk)),
        "wk": init(keys[2], (D, H * dk)), "bk": init(keys[3], (1, H * dk)),
        "wv": init(keys[4], (D, H * dk)), "bv": init(keys[5], (1, H * dk)),
        "wo": init(keys[6], (H * dk, D)), "bo": init(keys[7], (1, D)),
        "w1": init(keys[8], (D, dff)),    "b1": init(keys[9], (1, dff)),
        "w2": init(keys[10], (dff, D)),   "b2": init(keys[11], (1, D)),
    }

    x = jax.random.normal(keys[12], (B, S, D), dtype=jnp.float32)
    # padding mask: mask out the last 2 key positions (True = masked)
    attn_mask = jnp.zeros((B, S, S), dtype=jnp.bool_).at[:, :, -2:].set(True)

    out = encoder_layer(x, attn_mask, params, cfg)
    out = jax.block_until_ready(out)

    ref = encoder_layer_ref(x, attn_mask, params, cfg)
    assert out.shape == (B, S, D)
    # Tolerance accounts for bf16 MXU operands (f32 accumulation) and the
    # hardware approximate reciprocal in the softmax; reference is pure f32.
    assert jnp.allclose(out, ref, atol=2e-2, rtol=2e-2), float(jnp.max(jnp.abs(out - ref)))

    print("KERNEL_OK")
</pallas_src>

<mosaic_0001>
module attributes {stable_mosaic.version = 11 : i64} {
  func.func @encoder_layer_kernel(%arg0: i32, %arg1: memref<1x8x32xf32, #tpu.memory_space<vmem>>, %arg2: memref<1x8x8xf32, #tpu.memory_space<vmem>>, %arg3: memref<32x96xbf16, #tpu.memory_space<vmem>>, %arg4: memref<1x96xf32, #tpu.memory_space<vmem>>, %arg5: memref<32x32xbf16, #tpu.memory_space<vmem>>, %arg6: memref<1x32xf32, #tpu.memory_space<vmem>>, %arg7: memref<32x64xbf16, #tpu.memory_space<vmem>>, %arg8: memref<1x64xf32, #tpu.memory_space<vmem>>, %arg9: memref<64x32xbf16, #tpu.memory_space<vmem>>, %arg10: memref<1x32xf32, #tpu.memory_space<vmem>>, %arg11: memref<1x8x32xf32, #tpu.memory_space<vmem>>) attributes {dimension_semantics = [#tpu.dimension_semantics<parallel>], iteration_bounds = array<i64: 2>, scalar_prefetch = 0 : i64, scratch_operands = 0 : i64, tpu.core_type = #tpu.core_type<tc>, window_params = [{transform_indices = @transform_0, window_bounds = array<i64: 1, 8, 32>}, {transform_indices = @transform_1, window_bounds = array<i64: 1, 8, 8>}, {pipeline_mode = #tpu.pipeline_mode<synchronous>, transform_indices = @transform_2, window_bounds = array<i64: 32, 96>}, {pipeline_mode = #tpu.pipeline_mode<synchronous>, transform_indices = @transform_3, window_bounds = array<i64: 1, 96>}, {pipeline_mode = #tpu.pipeline_mode<synchronous>, transform_indices = @transform_4, window_bounds = array<i64: 32, 32>}, {pipeline_mode = #tpu.pipeline_mode<synchronous>, transform_indices = @transform_5, window_bounds = array<i64: 1, 32>}, {pipeline_mode = #tpu.pipeline_mode<synchronous>, transform_indices = @transform_6, window_bounds = array<i64: 32, 64>}, {pipeline_mode = #tpu.pipeline_mode<synchronous>, transform_indices = @transform_7, window_bounds = array<i64: 1, 64>}, {pipeline_mode = #tpu.pipeline_mode<synchronous>, transform_indices = @transform_8, window_bounds = array<i64: 64, 32>}, {pipeline_mode = #tpu.pipeline_mode<synchronous>, transform_indices = @transform_9, window_bounds = array<i64: 1, 32>}, {transform_indices = @transform_10, window_bounds = array<i64: 1, 8, 32>}]} {
    %c0 = arith.constant 0 : index
    %c0_0 = arith.constant 0 : index
    %c0_1 = arith.constant 0 : index
    %0 = vector.load %arg1[%c0, %c0_0, %c0_1] : memref<1x8x32xf32, #tpu.memory_space<vmem>>, vector<1x8x32xf32>
    %1 = vector.shape_cast %0 : vector<1x8x32xf32> to vector<8x32xf32>
    %2 = arith.truncf %1 : vector<8x32xf32> to vector<8x32xbf16>
    %c0_2 = arith.constant 0 : index
    %c0_3 = arith.constant 0 : index
    %c0_4 = arith.constant 0 : index
    %3 = vector.load %arg2[%c0_2, %c0_3, %c0_4] : memref<1x8x8xf32, #tpu.memory_space<vmem>>, vector<1x8x8xf32>
    %4 = vector.shape_cast %3 : vector<1x8x8xf32> to vector<8x8xf32>
    %c0_5 = arith.constant 0 : index
    %c0_6 = arith.constant 0 : index
    %5 = vector.load %arg3[%c0_5, %c0_6] : memref<32x96xbf16, #tpu.memory_space<vmem>>, vector<32x96xbf16>
    %cst = arith.constant dense<0.000000e+00> : vector<8x96xf32>
    %6 = tpu.matmul %2, %5, %cst {dimension_numbers = #tpu.dot_dimension_numbers<[1], [0], [0], [1], [0, 0, 1, 1], [], []>} : vector<8x32xbf16>, vector<32x96xbf16>, vector<8x96xf32> -> vector<8x96xf32>
    %c0_7 = arith.constant 0 : index
    %c0_8 = arith.constant 0 : index
    %7 = vector.load %arg4[%c0_7, %c0_8] : memref<1x96xf32, #tpu.memory_space<vmem>>, vector<1x96xf32>
    %8 = vector.broadcast %7 : vector<1x96xf32> to vector<8x96xf32>
    %9 = arith.addf %6, %8 : vector<8x96xf32>
    %10 = vector.extract_strided_slice %9 {offsets = [0, 0], sizes = [8, 32], strides = [1, 1]} : vector<8x96xf32> to vector<8x32xf32>
    %11 = vector.extract_strided_slice %9 {offsets = [0, 32], sizes = [8, 32], strides = [1, 1]} : vector<8x96xf32> to vector<8x32xf32>
    %12 = vector.extract_strided_slice %9 {offsets = [0, 64], sizes = [8, 32], strides = [1, 1]} : vector<8x96xf32> to vector<8x32xf32>
    %13 = vector.extract_strided_slice %10 {offsets = [0, 0], sizes = [8, 8], strides = [1, 1]} : vector<8x32xf32> to vector<8x8xf32>
    %14 = vector.extract_strided_slice %10 {offsets = [0, 8], sizes = [8, 8], strides = [1, 1]} : vector<8x32xf32> to vector<8x8xf32>
    %15 = vector.extract_strided_slice %10 {offsets = [0, 16], sizes = [8, 8], strides = [1, 1]} : vector<8x32xf32> to vector<8x8xf32>
    %16 = vector.extract_strided_slice %10 {offsets = [0, 24], sizes = [8, 8], strides = [1, 1]} : vector<8x32xf32> to vector<8x8xf32>
    %17 = vector.shape_cast %13 : vector<8x8xf32> to vector<1x8x8xf32>
    %18 = vector.shape_cast %14 : vector<8x8xf32> to vector<1x8x8xf32>
    %19 = vector.shape_cast %15 : vector<8x8xf32> to vector<1x8x8xf32>
    %20 = vector.shape_cast %16 : vector<8x8xf32> to vector<1x8x8xf32>
    %21 = tpu.concatenate %17, %18, %19, %20 in 0 : vector<1x8x8xf32>, vector<1x8x8xf32>, vector<1x8x8xf32>, vector<1x8x8xf32> -> vector<4x8x8xf32>
    %22 = arith.truncf %21 : vector<4x8x8xf32> to vector<4x8x8xbf16>
    %23 = vector.extract_strided_slice %11 {offsets = [0, 0], sizes = [8, 8], strides = [1, 1]} : vector<8x32xf32> to vector<8x8xf32>
    %24 = vector.extract_strided_slice %11 {offsets = [0, 8], sizes = [8, 8], strides = [1, 1]} : vector<8x32xf32> to vector<8x8xf32>
    %25 = vector.extract_strided_slice %11 {offsets = [0, 16], sizes = [8, 8], strides = [1, 1]} : vector<8x32xf32> to vector<8x8xf32>
    %26 = vector.extract_strided_slice %11 {offsets = [0, 24], sizes = [8, 8], strides = [1, 1]} : vector<8x32xf32> to vector<8x8xf32>
    %27 = vector.shape_cast %23 : vector<8x8xf32> to vector<1x8x8xf32>
    %28 = vector.shape_cast %24 : vector<8x8xf32> to vector<1x8x8xf32>
    %29 = vector.shape_cast %25 : vector<8x8xf32> to vector<1x8x8xf32>
    %30 = vector.shape_cast %26 : vector<8x8xf32> to vector<1x8x8xf32>
    %31 = tpu.concatenate %27, %28, %29, %30 in 0 : vector<1x8x8xf32>, vector<1x8x8xf32>, vector<1x8x8xf32>, vector<1x8x8xf32> -> vector<4x8x8xf32>
    %32 = arith.truncf %31 : vector<4x8x8xf32> to vector<4x8x8xbf16>
    %33 = vector.extract_strided_slice %12 {offsets = [0, 0], sizes = [8, 8], strides = [1, 1]} : vector<8x32xf32> to vector<8x8xf32>
    %34 = vector.extract_strided_slice %12 {offsets = [0, 8], sizes = [8, 8], strides = [1, 1]} : vector<8x32xf32> to vector<8x8xf32>
    %35 = vector.extract_strided_slice %12 {offsets = [0, 16], sizes = [8, 8], strides = [1, 1]} : vector<8x32xf32> to vector<8x8xf32>
    %36 = vector.extract_strided_slice %12 {offsets = [0, 24], sizes = [8, 8], strides = [1, 1]} : vector<8x32xf32> to vector<8x8xf32>
    %37 = vector.shape_cast %33 : vector<8x8xf32> to vector<1x8x8xf32>
    %38 = vector.shape_cast %34 : vector<8x8xf32> to vector<1x8x8xf32>
    %39 = vector.shape_cast %35 : vector<8x8xf32> to vector<1x8x8xf32>
    %40 = vector.shape_cast %36 : vector<8x8xf32> to vector<1x8x8xf32>
    %41 = tpu.concatenate %37, %38, %39, %40 in 0 : vector<1x8x8xf32>, vector<1x8x8xf32>, vector<1x8x8xf32>, vector<1x8x8xf32> -> vector<4x8x8xf32>
    %42 = arith.truncf %41 : vector<4x8x8xf32> to vector<4x8x8xbf16>
    "tpu.trace_start"() <{level = 10 : i32, message = "hqd,hkd->hqk"}> : () -> ()
    %cst_9 = arith.constant dense<0.000000e+00> : vector<4x8x8xf32>
    %43 = tpu.matmul %22, %32, %cst_9 {dimension_numbers = #tpu.dot_dimension_numbers<[2], [2], [1], [1], [0, 0, 0, 1, 1, 1], [0], [0]>} : vector<4x8x8xbf16>, vector<4x8x8xbf16>, vector<4x8x8xf32> -> vector<4x8x8xf32>
    "tpu.trace_stop"() : () -> ()
    %cst_10 = arith.constant 0.353553385 : f32
    %44 = vector.broadcast %cst_10 : f32 to vector<4x8x8xf32>
    %45 = arith.mulf %43, %44 : vector<4x8x8xf32>
    %46 = vector.shape_cast %4 : vector<8x8xf32> to vector<1x8x8xf32>
    %cst_11 = arith.constant 0.000000e+00 : f32
    %47 = vector.broadcast %cst_11 : f32 to vector<1x8x8xf32>
    %48 = arith.cmpf ogt, %46, %47 : vector<1x8x8xf32>
    %cst_12 = arith.constant -1.000000e+09 : f32
    %49 = vector.shape_cast %48 : vector<1x8x8xi1> to vector<1x8x8xi1>
    %50 = vector.broadcast %49 : vector<1x8x8xi1> to vector<4x8x8xi1>
    %51 = vector.broadcast %cst_12 : f32 to vector<4x8x8xf32>
    %52 = arith.select %50, %51, %45 : vector<4x8x8xi1>, vector<4x8x8xf32>
    %cst_13 = arith.constant dense<0xFF800000> : vector<4x8xf32>
    %53 = vector.multi_reduction <maximumf>, %52, %cst_13 [2] : vector<4x8x8xf32> to vector<4x8xf32>
    %54 = vector.shape_cast %53 : vector<4x8xf32> to vector<4x8x1xf32>
    %55 = vector.broadcast %54 : vector<4x8x1xf32> to vector<4x8x8xf32>
    %56 = arith.subf %52, %55 : vector<4x8x8xf32>
    %57 = math.exp %56 : vector<4x8x8xf32>
    %cst_14 = arith.constant dense<0.000000e+00> : vector<4x8xf32>
    %58 = vector.multi_reduction <add>, %57, %cst_14 [2] : vector<4x8x8xf32> to vector<4x8xf32>
    %59 = vector.shape_cast %58 : vector<4x8xf32> to vector<4x8x1xf32>
    %60 = tpu.reciprocal %59 {approx = true} : vector<4x8x1xf32> -> vector<4x8x1xf32>
    %61 = vector.broadcast %60 : vector<4x8x1xf32> to vector<4x8x8xf32>
    %62 = arith.mulf %57, %61 : vector<4x8x8xf32>
    %63 = arith.truncf %62 : vector<4x8x8xf32> to vector<4x8x8xbf16>
    "tpu.trace_start"() <{level = 10 : i32, message = "hqk,hkd->hqd"}> : () -> ()
    %cst_15 = arith.constant dense<0.000000e+00> : vector<4x8x8xf32>
    %64 = tpu.matmul %63, %42, %cst_15 {dimension_numbers = #tpu.dot_dimension_numbers<[2], [1], [1], [2], [0, 0, 0, 1, 1, 2], [0], [0]>} : vector<4x8x8xbf16>, vector<4x8x8xbf16>, vector<4x8x8xf32> -> vector<4x8x8xf32>
    "tpu.trace_stop"() : () -> ()
    %65 = vector.extract_strided_slice %64 {offsets = [0, 0, 0], sizes = [1, 8, 8], strides = [1, 1, 1]} : vector<4x8x8xf32> to vector<1x8x8xf32>
    %66 = vector.shape_cast %65 : vector<1x8x8xf32> to vector<8x8xf32>
    %67 = vector.extract_strided_slice %64 {offsets = [1, 0, 0], sizes = [1, 8, 8], strides = [1, 1, 1]} : vector<4x8x8xf32> to vector<1x8x8xf32>
    %68 = vector.shape_cast %67 : vector<1x8x8xf32> to vector<8x8xf32>
    %69 = vector.extract_strided_slice %64 {offsets = [2, 0, 0], sizes = [1, 8, 8], strides = [1, 1, 1]} : vector<4x8x8xf32> to vector<1x8x8xf32>
    %70 = vector.shape_cast %69 : vector<1x8x8xf32> to vector<8x8xf32>
    %71 = vector.extract_strided_slice %64 {offsets = [3, 0, 0], sizes = [1, 8, 8], strides = [1, 1, 1]} : vector<4x8x8xf32> to vector<1x8x8xf32>
    %72 = vector.shape_cast %71 : vector<1x8x8xf32> to vector<8x8xf32>
    %73 = tpu.concatenate %66, %68, %70, %72 in 1 : vector<8x8xf32>, vector<8x8xf32>, vector<8x8xf32>, vector<8x8xf32> -> vector<8x32xf32>
    %74 = arith.truncf %73 : vector<8x32xf32> to vector<8x32xbf16>
    %c0_16 = arith.constant 0 : index
    %c0_17 = arith.constant 0 : index
    %75 = vector.load %arg5[%c0_16, %c0_17] : memref<32x32xbf16, #tpu.memory_space<vmem>>, vector<32x32xbf16>
    %cst_18 = arith.constant dense<0.000000e+00> : vector<8x32xf32>
    %76 = tpu.matmul %74, %75, %cst_18 {dimension_numbers = #tpu.dot_dimension_numbers<[1], [0], [0], [1], [0, 0, 1, 1], [], []>} : vector<8x32xbf16>, vector<32x32xbf16>, vector<8x32xf32> -> vector<8x32xf32>
    %c0_19 = arith.constant 0 : index
    %c0_20 = arith.constant 0 : index
    %77 = vector.load %arg6[%c0_19, %c0_20] : memref<1x32xf32, #tpu.memory_space<vmem>>, vector<1x32xf32>
    %78 = vector.broadcast %77 : vector<1x32xf32> to vector<8x32xf32>
    %79 = arith.addf %76, %78 : vector<8x32xf32>
    %80 = arith.truncf %79 : vector<8x32xf32> to vector<8x32xbf16>
    %c0_21 = arith.constant 0 : index
    %c0_22 = arith.constant 0 : index
    %81 = vector.load %arg7[%c0_21, %c0_22] : memref<32x64xbf16, #tpu.memory_space<vmem>>, vector<32x64xbf16>
    %cst_23 = arith.constant dense<0.000000e+00> : vector<8x64xf32>
    %82 = tpu.matmul %80, %81, %cst_23 {dimension_numbers = #tpu.dot_dimension_numbers<[1], [0], [0], [1], [0, 0, 1, 1], [], []>} : vector<8x32xbf16>, vector<32x64xbf16>, vector<8x64xf32> -> vector<8x64xf32>
    %c0_24 = arith.constant 0 : index
    %c0_25 = arith.constant 0 : index
    %83 = vector.load %arg8[%c0_24, %c0_25] : memref<1x64xf32, #tpu.memory_space<vmem>>, vector<1x64xf32>
    %84 = vector.broadcast %83 : vector<1x64xf32> to vector<8x64xf32>
    %85 = arith.addf %82, %84 : vector<8x64xf32>
    %cst_26 = arith.constant 5.000000e-01 : f32
    %86 = vector.broadcast %cst_26 : f32 to vector<8x64xf32>
    %87 = arith.mulf %85, %86 : vector<8x64xf32>
    %cst_27 = arith.constant 0.707106769 : f32
    %88 = vector.broadcast %cst_27 : f32 to vector<8x64xf32>
    %89 = arith.mulf %85, %88 : vector<8x64xf32>
    %90 = math.erf %89 : vector<8x64xf32>
    %cst_28 = arith.constant 1.000000e+00 : f32
    %91 = vector.broadcast %cst_28 : f32 to vector<8x64xf32>
    %92 = arith.addf %91, %90 : vector<8x64xf32>
    %93 = arith.mulf %87, %92 : vector<8x64xf32>
    %94 = arith.truncf %93 : vector<8x64xf32> to vector<8x64xbf16>
    %c0_29 = arith.constant 0 : index
    %c0_30 = arith.constant 0 : index
    %95 = vector.load %arg9[%c0_29, %c0_30] : memref<64x32xbf16, #tpu.memory_space<vmem>>, vector<64x32xbf16>
    %cst_31 = arith.constant dense<0.000000e+00> : vector<8x32xf32>
    %96 = tpu.matmul %94, %95, %cst_31 {dimension_numbers = #tpu.dot_dimension_numbers<[1], [0], [0], [1], [0, 0, 1, 1], [], []>} : vector<8x64xbf16>, vector<64x32xbf16>, vector<8x32xf32> -> vector<8x32xf32>
    %c0_32 = arith.constant 0 : index
    %c0_33 = arith.constant 0 : index
    %97 = vector.load %arg10[%c0_32, %c0_33] : memref<1x32xf32, #tpu.memory_space<vmem>>, vector<1x32xf32>
    %98 = vector.broadcast %97 : vector<1x32xf32> to vector<8x32xf32>
    %99 = arith.addf %96, %98 : vector<8x32xf32>
    %c0_34 = arith.constant 0 : index
    %c0_35 = arith.constant 0 : index
    %c0_36 = arith.constant 0 : index
    %100 = vector.load %arg11[%c0_34, %c0_35, %c0_36] : memref<1x8x32xf32, #tpu.memory_space<vmem>>, vector<1x8x32xf32>
    %101 = vector.shape_cast %100 : vector<1x8x32xf32> to vector<8x32xf32>
    %102 = vector.shape_cast %99 : vector<8x32xf32> to vector<1x8x32xf32>
    tpu.vector_store %arg11[%c0_34, %c0_35, %c0_36], %102 {strides = array<i32>} : memref<1x8x32xf32, #tpu.memory_space<vmem>>, vector<1x8x32xf32>,
    return
  }
  func.func @transform_0(%arg0: i32) -> (i32, i32, i32) {
    %c0_i32 = arith.constant 0 : i32
    %c0_i32_0 = arith.constant 0 : i32
    %c0_i32_1 = arith.constant 0 : i32
    return %arg0, %c0_i32, %c0_i32_0 : i32, i32, i32
  }
  func.func @transform_1(%arg0: i32) -> (i32, i32, i32) {
    %c0_i32 = arith.constant 0 : i32
    %c0_i32_0 = arith.constant 0 : i32
    %c0_i32_1 = arith.constant 0 : i32
    return %arg0, %c0_i32, %c0_i32_0 : i32, i32, i32
  }
  func.func @transform_2(%arg0: i32) -> (i32, i32) {
    %c0_i32 = arith.constant 0 : i32
    %c0_i32_0 = arith.constant 0 : i32
    %c0_i32_1 = arith.constant 0 : i32
    return %c0_i32, %c0_i32_0 : i32, i32
  }
  func.func @transform_3(%arg0: i32) -> (i32, i32) {
    %c0_i32 = arith.constant 0 : i32
    %c0_i32_0 = arith.constant 0 : i32
    %c0_i32_1 = arith.constant 0 : i32
    return %c0_i32, %c0_i32_0 : i32, i32
  }
  func.func @transform_4(%arg0: i32) -> (i32, i32) {
    %c0_i32 = arith.constant 0 : i32
    %c0_i32_0 = arith.constant 0 : i32
    %c0_i32_1 = arith.constant 0 : i32
    return %c0_i32, %c0_i32_0 : i32, i32
  }
  func.func @transform_5(%arg0: i32) -> (i32, i32) {
    %c0_i32 = arith.constant 0 : i32
    %c0_i32_0 = arith.constant 0 : i32
    %c0_i32_1 = arith.constant 0 : i32
    return %c0_i32, %c0_i32_0 : i32, i32
  }
  func.func @transform_6(%arg0: i32) -> (i32, i32) {
    %c0_i32 = arith.constant 0 : i32
    %c0_i32_0 = arith.constant 0 : i32
    %c0_i32_1 = arith.constant 0 : i32
    return %c0_i32, %c0_i32_0 : i32, i32
  }
  func.func @transform_7(%arg0: i32) -> (i32, i32) {
    %c0_i32 = arith.constant 0 : i32
    %c0_i32_0 = arith.constant 0 : i32
    %c0_i32_1 = arith.constant 0 : i32
    return %c0_i32, %c0_i32_0 : i32, i32
  }
  func.func @transform_8(%arg0: i32) -> (i32, i32) {
    %c0_i32 = arith.constant 0 : i32
    %c0_i32_0 = arith.constant 0 : i32
    %c0_i32_1 = arith.constant 0 : i32
    return %c0_i32, %c0_i32_0 : i32, i32
  }
  func.func @transform_9(%arg0: i32) -> (i32, i32) {
    %c0_i32 = arith.constant 0 : i32
    %c0_i32_0 = arith.constant 0 : i32
    %c0_i32_1 = arith.constant 0 : i32
    return %c0_i32, %c0_i32_0 : i32, i32
  }
  func.func @transform_10(%arg0: i32) -> (i32, i32, i32) {
    %c0_i32 = arith.constant 0 : i32
    %c0_i32_0 = arith.constant 0 : i32
    %c0_i32_1 = arith.constant 0 : i32
    return %arg0, %c0_i32, %c0_i32_0 : i32, i32, i32
  }
}

</mosaic_0001>

<bundles_post_ra>
// kernel: tpu_custom_call.1
= control target key start
LH: loop header
LB: loop body
LE: loop exit
PB: predicated region body
PF: predicated region fallthrough
CT: control target
= control target key end

     0   :  { %15 = vsyncpa [#allocation3], 0  ;;  %s2010_s0 = inlined_call_operand.vmem [shape: f32[2,8,32], index: 0, kind: input, shape index: {}]   ;;  %s2011_s1 = inlined_call_operand.vmem [shape: f32[2,8,8], index: 1, kind: input, shape index: {}]   ;;  %s2012_s2 = inlined_call_operand.vmem [shape: bf16[32,96], index: 2, kind: input, shape index: {}]   ;;  %s2013_s3 = inlined_call_operand.vmem [shape: f32[1,96], index: 3, kind: input, shape index: {}]   ;;  %s2014_s4 = inlined_call_operand.hbm [shape: bf16[32,32], index: 4, kind: input, shape index: {}]   ;;  %s2015_s5 = inlined_call_operand.vmem [shape: f32[1,32], index: 5, kind: input, shape index: {}]   ;;  %s2016_s6 = inlined_call_operand.hbm [shape: bf16[32,64], index: 6, kind: input, shape index: {}]   ;;  %s2017_s7 = inlined_call_operand.vmem [shape: f32[1,64], index: 7, kind: input, shape index: {}]   ;;  %s2018_s8 = inlined_call_operand.vmem [shape: bf16[64,32], index: 8, kind: input, shape index: {}]   ;;  %s2019_s9 = inlined_call_operand.vmem [shape: f32[1,32], index: 9, kind: input, shape index: {}]   ;;  %s2020_s10 = inlined_call_operand.hbm [shape: f32[2,8,32], index: 10, kind: output, shape index: {}]  }
   0x1   :  { %16 = vsyncpa [#allocation6], 0 }
   0x2   :  { %17 = vsyncpa [#allocation4], 0 }
   0x3   :  { %19 = vsyncpa [#allocation4 + $0x1], 0  ;;  %s1731_s13 = smov 0   ;;  %s1733_s14 = smov 0  }
   0x4   :  { %s1735_s15 = smov 0   ;;  %s1737_s16 = smov 0  }
   0x5 LB: > { %s1752_s17 = sadd.s32 4294967295, %s1659_s16   ;;  %s1284_s18 = sadd.s32 4294967294, %s1659_s16   ;;  %s1659_s16 = sphi %s1737_s16, %s2034_s16   ;;  %s1655_s15 = sphi %s1735_s15, %s2033_s15   ;;  %s1651_s14 = sphi %s1733_s14, %s2032_s14   ;;  %s1647_s13 = sphi %s1731_s13, %s2031_s13  }
   0x6   : > { %s1756_s19 = sadd.s32 1, %s1659_s16   ;;  %s252_s20 = sadd.s32 1, %s1655_s15 }
   0x7   : > { %s249_s21 = ssub.s32 %s1659_s16, %s1756_s19  ;;  %p262_p0 = scmp.ne.s32.totalorder %s1655_s15, %s1651_s14 }
   0x8   : > { %p250_p1 = scmp.eq.s32.totalorder %s249_s21, 0  ;;  %p263_p2 = scmp.eq.s32.totalorder %s1752_s17, 1 }
   0x9   : > { %p268_p3 = scmp.ne.s32.totalorder %s1651_s14, %s1647_s13  ;;  %p269_p4 = scmp.eq.s32.totalorder %s1284_s18, 1 }
   0xa   : > { %s1767_s22 = scalar_select %p250_p1, %s1655_s15, %s252_s20  }
   0xb   : > { %p1769_p5 = por %p263_p2, %p262_p0  ;;  %p1773_p6 = por %p269_p4, %p268_p3 }
   0xc   : > { %p1285_p7 = scmp.ge.s32.totalorder %s1659_s16, 1  ;;  %p276_p8 = scmp.lt.s32.totalorder %s1659_s16, 3 }
   0xd   : > { %s2023_s24 = scalar_select %p1773_p6, 1, 0 }
   0xe   : > { %p2021_p9 = scmp.eq.s32.totalorder %s1752_s17, 0  ;;  %p1780_p10 = pnand %p1285_p7, %p276_p8 }
   0xf   : > { %s1661_s26 = smov [#allocation2]   ;;  %s1662_s29 = smov [#allocation5]  }
  0x10   : > { %s294_s27 = sshll.u32 %s1661_s26, 4  ;;  %p1449_p11 = pneg %p1780_p10  ;;  %s295_s27 = int_to_ptr.vmem [resolvable:$true] %s294_s27 }
  0x11   : > { %s310_s30 = sshll.u32 %s1662_s29, 4  ;;  %s1550_s11 = scalar_lea.vmem %s295_s27, 256  ;;  %s311_s30 = int_to_ptr.vmem [resolvable:$true] %s310_s30 }
  0x12   : > { %p1788_p12 = pnand %p2021_p9, %p1449_p11  ;;  %p1551_p0 = scmp.ne.s32.totalorder %s295_s27, %s1550_s11 }
  0x13   : > { %p1558_p3 = scmp.lt.s32.totalorder %s295_s27, %s295_s27  ;;  %p1559_p4 = scmp.lt.s32.totalorder %s1550_s11, %s1550_s11 }
  0x14   : > { %p1541_p13 = pneg %p1788_p12 }
  0x15   : > { %p1560_p7 = por %p1559_p4, %p1558_p3 }
  0x16   : > { %p1553_p1 = pnand %p1551_p0, %p1541_p13 }
  0x18   : > { %p1554_p2 = pneg %p1553_p1 }
  0x1a   : > { %p1561_p8 = pnand %p1560_p7, %p1554_p2 }
  0x1c   : > { %1564 = shalt.err (!%p1561_p8)
}
  0x1d   : > { %s1663_s12 = smov 64   ;;  %s1664_s18 = smov 4  }
  0x1e   : > { %1452 = dma.hbm_to_vmem [thread:$0]  (!%p1788_p12), %s2014_s4, 256, %s295_s27, [#allocation3], %s1663_s12, %s1663_s12, %s1664_s18  }
  0x1f   : > { %s1576_s26 = scalar_lea.vmem %s311_s30, 256  ;;  %p1584_p9 = scmp.lt.s32.totalorder %s311_s30, %s311_s30 }
  0x20   : > { %p1577_p11 = scmp.ne.s32.totalorder %s311_s30, %s1576_s26  ;;  %p1585_p6 = scmp.lt.s32.totalorder %s1576_s26, %s1576_s26 }
  0x22   : > { %p1579_p0 = pnand %p1577_p11, %p1541_p13  ;;  %p1586_p3 = por %p1585_p6, %p1584_p9 }
  0x24   : > { %p1580_p1 = pneg %p1579_p0 }
  0x26   : > { %p1587_p2 = pnand %p1586_p3, %p1580_p1 }
  0x28   : > { %1590 = shalt.err (!%p1587_p2)
}
  0x29   : > { %1455 = dma.hbm_to_vmem [thread:$0]  (!%p1788_p12), %s2016_s6, 256, %s311_s30, [#allocation6], %s1663_s12, %s1663_s12, %s1664_s18  }
  0x2a   : > { %349 = sbr.rel (%p1780_p10) target bundleno = 1948 (0x79c), region = 60  ;;  %p2026_p4 = scmp.eq.s32.totalorder (!%p1780_p10), %s1752_s17, 0 }
  0x2f   : > { %1634 = dma.done.wait (%p2026_p4), [#allocation3], 256   ;;  %p2027_p13 = pmov %p2026_p4 }
  0x30   : > { %p2028_p7 = pmov %p2026_p4 }
  0x31   : > { %1636 = vsyncadd (%p2027_p13), [#allocation3], 4294967040 }
  0x32   : > { %1638 = dma.done.wait (%p2028_p7), [#allocation6], 256   ;;  %p2029_p6 = pmov %p2026_p4 }
  0x33   : > { %p394_p9 = scmp.lt.s32.totalorder %s1752_s17, 1  ;;  %v1665_v0 = vmov 0.0   ;;  %vm1666_vm0 = vmmov 0   ;;  %v1511_v1 = vld [vmem:[%s2012_s2 + $0x8] sm:$0xff]   ;;  %v1512_v2 = vld [vmem:[%s2012_s2] sm:$0xff]   ;;  %vm429_vm1 = vcmask 261120  }
  0x34   : > { %1640 = vsyncadd (%p2029_p6), [#allocation6], 4294967040  ;;  %1355 = vmatprep.subr.bf16.mxu0 %v1665_v0  ;;  %1359 = vmatprep.mubr.msk.bf16.mxu0 %vm1666_vm0, %v1665_v0  ;;  %v1295_v5 = vld [vmem:[%s2013_s3] ss:$0 sm:$0xff]  ;;  %s1667_s28 = smov 104   ;;  %s1668_s30 = smov 120  }
  0x35   : > { %s1825_s25 = scalar_select %p394_p9, %s1752_s17, 1  ;;  %1363 = vmatprep.subr.bf16.mxu1 %v1665_v0  ;;  %1365 = vmatprep.mubr.msk.bf16.mxu1 %vm1666_vm0, %v1665_v0  ;;  %vm490_vm2 = vcmask 64512   ;;  %vm748_vm4 = vcmask 1043456   ;;  %vm949_vm5 = vcmask 130048   ;;  %vm951_vm6 = vcmask 195584  }
  0x36   : > { %1356 = vmatpush3.bf16.msra.mxu0 %v1511_v1  ;;  %s1670_s18 = smov 96   ;;  %s1673_s29 = smov 16   ;;  %vm1132_vm7 = vcmask 523264  }
  0x37   : > { %s1293_s27 = sshll.u32 %s1825_s25, 3  ;;  %1357 = vmatprep.subr.bf16.mxu0 %v1665_v0  ;;  %s1671_s25 = smov 64  }
  0x38   : > { %s397_s12 = scalar_lea.vmem %s2010_s0, %s1293_s27  ;;  %s401_s26 = scalar_lea.vmem %s2011_s1, %s1293_s27 }
  0x39   : > { %v403_v3 = vld [vmem:[%s397_s12] sm:$0xff]  ;;  %s1669_s12 = smov 112   ;;  %s1672_s27 = smov 8  }
  0x3a   : > { %v404_v4 = vpack.c.bf16 %v403_v3, %v403_v3  ;;  %1358 = vmatpush3.bf16.msra.mxu0 %v1512_v2  ;;  %v405_v26 = vld [vmem:[%s401_s26] sm:$0xff]  ;;  %s1674_s11 = smov 24   ;;  %s1322_s21 = sshll.u32 %s1752_s17, 7 }
  0x3b   : > { %1369 = vmatprep.subr.bf16.mxu0 %v1665_v0  ;;  %vm688_vm3 = vcmp.gt.f32.partialorder %v405_v26, 0.0 }
  0x3d   : > { %1360 = vmatmul.mubr.msk.bf16.vlgmr.msra.gmra.mxu0 %vm429_vm1, %v404_v4 }
  0x3e   : > { %1371 = vmatprep.mubr.msk.bf16.mxu0 %vm1666_vm0, %v1665_v0 }
  0xfd   : > { %v467_v6 = vpop.f32.mrf.mxu0 }
  0xfe   : > { %v468_v7 = vadd.f32 %v1295_v5, %v467_v6 }
  0xff   : > { %v1361_v8 = vpop.f32.mrf.mxu0 }
 0x100   : > { %480 = vrot.lane.b32.xlu1 %v468_v7, %s1667_s28  ;;  %474 = vrot.lane.b32.xlu0 %v468_v7, %s1668_s30  ;;  %v1850_v10 = vpack.c.bf16 %v468_v7, %v468_v7  ;;  %s391_s30 = sand.u32 1, %s1651_s14  }
 0x101   : > { %v470_v9 = vpop.f32.mrf.mxu0  ;;  %s1178_s28 = scalar_lea.sflag [#allocation4], %s391_s30 }
 0x103   : > { %v1362_v11 = vpop.f32.mrf.mxu0 }
 0x104   : > { %477 = vrot.lane.b32.xlu0 %v468_v7, %s1669_s12  ;;  %488 = vrot.lane.b32.xlu1 %v1850_v10, %s1670_s18  ;;  %s1292_s12 = sshll.u32 %s391_s30, 3 }
 0x105   : > { %s393_s26 = scalar_lea.vmem [#allocation7], %s1292_s12  ;;  %s1675_s12 = smov [#allocation7]  }
 0x172   : > { %v481_v12 = vpop.permute.xlu1 %480  ;;  %v475_v13 = vpop.permute.xlu0 %474 }
 0x173   : > { %v1853_v14 = vpack.c.bf16 %v475_v13, %v475_v13  ;;  %v1856_v17 = vpack.c.bf16 %v481_v12, %v481_v12 }
 0x175   : > { %538 = vrot.lane.b32.xlu0 %v1853_v14, %s1670_s18 }
 0x176   : > { %v478_v15 = vpop.permute.xlu0 %477  ;;  %v489_v16 = vpop.permute.xlu1 %488 }
 0x177   : > { %v1858_v18 = vpack.c.bf16 %v478_v15, %v478_v15  ;;  %v495_v19 = vsel %vm490_vm2, %v489_v16, 0 }
 0x178   : > { %1364 = vmatpush3.bf16.xpose.msra.mxu1 %v495_v19 }
 0x179   : > { %636 = vrot.lane.b32.xlu0 %v1856_v17, %s1670_s18  ;;  %587 = vrot.lane.b32.xlu1 %v1858_v18, %s1670_s18  ;;  %s1595_s18 = sshll.u32 %s1675_s12, 4  ;;  %s1596_s18 = int_to_ptr.vmem [resolvable:$false] %s1595_s18 }
 0x17a   : > { %1375 = vmatprep.subr.bf16.mxu1 %v1665_v0  ;;  %s1597_s20 = scalar_lea.vmem %s1596_s18, 256 }
 0x17f   : > { %1366 = vmatmul.mubr.msk.bf16.vlgmr.msra.gmra.mxu1 %vm490_vm2, %v1850_v10 }
 0x180   : > { %1377 = vmatprep.mubr.msk.bf16.mxu1 %vm1666_vm0, %v1665_v0 }
 0x1e7   : > { %v539_v20 = vpop.permute.xlu0 %538 }
 0x1e8   : > { %v544_v21 = vsel %vm490_vm2, %v539_v20, 0 }
 0x1e9   : > { %1370 = vmatpush3.bf16.xpose.msra.mxu0 %v544_v21 }
 0x1ea   : > { %1381 = vmatprep.subr.bf16.mxu0 %v1665_v0 }
 0x1eb   : > { %v588_v22 = vpop.permute.xlu1 %587  ;;  %v637_v24 = vpop.permute.xlu0 %636 }
 0x1ec   : > { %v593_v23 = vsel %vm490_vm2, %v588_v22, 0  ;;  %v642_v25 = vsel %vm490_vm2, %v637_v24, 0 }
 0x1ed   : > { %1376 = vmatpush3.bf16.xpose.msra.mxu1 %v593_v23 }
 0x1ee   : > { %1387 = vmatprep.subr.bf16.mxu1 %v1665_v0 }
 0x1f0   : > { %1372 = vmatmul.mubr.msk.bf16.vlgmr.msra.gmra.mxu0 %vm490_vm2, %v1853_v14 }
 0x1f1   : > { %1382 = vmatpush3.bf16.xpose.msra.mxu0 %v642_v25  ;;  %1383 = vmatprep.mubr.msk.bf16.mxu0 %vm1666_vm0, %v1665_v0 }
 0x1f2   : > { %1393 = vmatprep.subr.bf16.mxu0 %v1665_v0 }
 0x1f4   : > { %1378 = vmatmul.mubr.msk.bf16.vlgmr.msra.gmra.mxu1 %vm490_vm2, %v1858_v18 }
 0x1f5   : > { %1389 = vmatprep.mubr.msk.bf16.mxu1 %vm1666_vm0, %v1665_v0 }
 0x1f8   : > { %1384 = vmatmul.mubr.msk.bf16.vlgmr.msra.gmra.mxu0 %vm490_vm2, %v1856_v17 }
 0x1f9   : > { %1395 = vmatprep.mubr.msk.bf16.mxu0 %vm1666_vm0, %v1665_v0 }
 0x23f   : > { %v531_v27 = vpop.f32.mrf.mxu1 }
 0x240   : > { %v684_v28 = vmul.f32 0.35355338, %v531_v27 }
 0x241   : > { %v1367_v29 = vpop.f32.mrf.mxu1 }
 0x242   : > { %v691_v30 = vsel %vm688_vm3, -1e+09, %v684_v28 }
 0x243   : > { %v534_v31 = vpop.f32.mrf.mxu1  ;;  %v695_v32 = vsel %vm490_vm2, %v691_v30, -inf }
 0x244   : > { %696 = vmax.xlane.f32.xlu1 %v695_v32 }
 0x245   : > { %v1368_v33 = vpop.f32.mrf.mxu1 }
 0x2b0   : > { %v580_v34 = vpop.f32.mrf.mxu0 }
 0x2b1   : > { %v685_v35 = vmul.f32 0.35355338, %v580_v34 }
 0x2b2   : > { %v1373_v36 = vpop.f32.mrf.mxu0 }
 0x2b3   : > { %v692_v37 = vsel %vm688_vm3, -1e+09, %v685_v35 }
 0x2b4   : > { %v583_v38 = vpop.f32.mrf.mxu0  ;;  %v629_v39 = vpop.f32.mrf.mxu1  ;;  %v698_v40 = vsel %vm490_vm2, %v692_v37, -inf }
 0x2b5   : > { %v686_v41 = vmul.f32 0.35355338, %v629_v39  ;;  %699 = vmax.xlane.f32.xlu0 %v698_v40  ;;  %v1513_v40 = vld [vmem:[#allocation2 + $0x8] sm:$0xff]  }
 0x2b6   : > { %v1374_v42 = vpop.f32.mrf.mxu0  ;;  %v1379_v43 = vpop.f32.mrf.mxu1 }
 0x2b7   : > { %v693_v44 = vsel %vm688_vm3, -1e+09, %v686_v41  ;;  %v1514_v41 = vld [vmem:[#allocation2] sm:$0xff]   ;;  %v1515_v42 = vld [vmem:[#allocation5 + $0x8] sm:$0xff]  }
 0x2b8   : > { %v632_v45 = vpop.f32.mrf.mxu1  ;;  %v678_v46 = vpop.f32.mrf.mxu0  ;;  %v701_v47 = vsel %vm490_vm2, %v693_v44, -inf }
 0x2b9   : > { %v687_v48 = vmul.f32 0.35355338, %v678_v46  ;;  %702 = vmax.xlane.f32.xlu0 %v701_v47 }
 0x2ba   : > { %v1380_v49 = vpop.f32.mrf.mxu1  ;;  %v1385_v50 = vpop.f32.mrf.mxu0 }
 0x2bb   : > { %v694_v51 = vsel %vm688_vm3, -1e+09, %v687_v48 }
 0x2bc   : > { %v681_v52 = vpop.f32.mrf.mxu0  ;;  %v704_v53 = vsel %vm490_vm2, %v694_v51, -inf }
 0x2bd   : > { %705 = vmax.xlane.f32.xlu1 %v704_v53 }
 0x2be   : > { %v1386_v54 = vpop.f32.mrf.mxu0 }
 0x2cd   : > { %v697_v55 = vpop.xlane.xlu1 %696 }
 0x2ce   : > { %792 = vrot.lane.b32.xlu1 %v1853_v14, %s1671_s25  ;;  %v707_v56 = vsub.f32 %v691_v30, %v697_v55 }
 0x2cf   : > { %743 = vrot.lane.b32.xlu0 %v1850_v10, %s1671_s25 }
 0x2d0   : > { %v711_v57 = vmul.f32 1.442695, %v707_v56 }
 0x2d2   : > { %1521 = vpow2.f32 %v711_v57 }
 0x2df   : > { %v1522_v58 = vpop.eup %1521 }
 0x2e0   : > { %v719_v59 = vsel %vm490_vm2, %v1522_v58, 0.0 }
 0x2ee   : > { %720 = vadd.xlane.f32.xlu0 %v719_v59 }
 0x33e   : > { %v700_v60 = vpop.xlane.xlu0 %699 }
 0x33f   : > { %v708_v61 = vsub.f32 %v692_v37, %v700_v60 }
 0x341   : > { %v713_v62 = vmul.f32 1.442695, %v708_v61 }
 0x342   : > { %v703_v63 = vpop.xlane.xlu0 %702 }
 0x343   : > { %1523 = vpow2.f32 %v713_v62  ;;  %v709_v1 = vsub.f32 %v693_v44, %v703_v63  ;;  %v1516_v62 = vld [vmem:[#allocation5] sm:$0xff]   ;;  %v1307_v63 = vld [vmem:[%s2015_s5] ss:$0 sm:$0xff] }
 0x345   : > { %v715_v2 = vmul.f32 1.442695, %v709_v1 }
 0x346   : > { %v744_v3 = vpop.permute.xlu0 %743  ;;  %v706_v4 = vpop.xlane.xlu1 %705 }
 0x347   : > { %1525 = vpow2.f32 %v715_v2  ;;  %v750_v5 = vsel %vm748_vm4, %v744_v3, 0  ;;  %v710_v6 = vsub.f32 %v694_v51, %v706_v4 }
 0x348   : > { %1388 = vmatpush3.bf16.msra.mxu1 %v750_v5 }
 0x349   : > { %v717_v7 = vmul.f32 1.442695, %v710_v6  ;;  %1399 = vmatprep.subr.bf16.mxu1 %v1665_v0 }
 0x34a   : > { %v793_v8 = vpop.permute.xlu1 %792 }
 0x34b   : > { %1527 = vpow2.f32 %v717_v7  ;;  %v798_v9 = vsel %vm748_vm4, %v793_v8, 0  ;;  %v1517_v7 = vld [vmem:[%s2018_s8 + $0x18] sm:$0xff]   ;;  %v1518_v8 = vld [vmem:[%s2018_s8 + $0x10] sm:$0xff]  }
 0x34c   : > { %1394 = vmatpush3.bf16.msra.mxu0 %v798_v9  ;;  %v1519_v9 = vld [vmem:[%s2018_s8 + $0x8] sm:$0xff]  }
 0x34d   : > { %1405 = vmatprep.subr.bf16.mxu0 %v1665_v0 }
 0x350   : > { %v1524_v10 = vpop.eup %1523 }
 0x351   : > { %v722_v11 = vsel %vm490_vm2, %v1524_v10, 0.0 }
 0x352   : > { %723 = vadd.xlane.f32.xlu1 %v722_v11  ;;  %v1311_v11 = vld [vmem:[%s2017_s7] ss:$0 sm:$0xff] }
 0x354   : > { %v1526_v12 = vpop.eup %1525 }
 0x355   : > { %v725_v13 = vsel %vm490_vm2, %v1526_v12, 0.0 }
 0x356   : > { %726 = vadd.xlane.f32.xlu0 %v725_v13 }
 0x358   : > { %v1528_v14 = vpop.eup %1527 }
 0x359   : > { %v728_v15 = vsel %vm490_vm2, %v1528_v14, 0.0 }
 0x35a   : > { %729 = vadd.xlane.f32.xlu1 %v728_v15 }
 0x36b   : > { %840 = vrot.lane.b32.xlu1 %v1858_v18, %s1671_s25 }
 0x36c   : > { %888 = vrot.lane.b32.xlu0 %v1856_v17, %s1671_s25  ;;  %s1191_s25 = sshll.u32 %s393_s26, 4  ;;  %s1970_s25 = int_to_ptr.vmem [resolvable:$true] %s1191_s25 }
 0x36d   : > { %s1591_s17 = scalar_lea.vmem %s1970_s25, 128  ;;  %p1598_p11 = scmp.lt.s32.totalorder %s1970_s25, %s1596_s18 }
 0x36e   : > { %p1592_p10 = scmp.ne.s32.totalorder %s1970_s25, %s1591_s17  ;;  %p1599_p0 = scmp.lt.s32.totalorder %s1597_s20, %s1591_s17 }
 0x370   : > { %p1593_p12 = pnand %p1592_p10, %p1769_p5  ;;  %p1600_p1 = por %p1599_p0, %p1598_p11 }
 0x372   : > { %p1594_p8 = pneg %p1593_p12 }
 0x374   : > { %p1601_p3 = pnand %p1600_p1, %p1594_p8 }
 0x377   : > { %v721_v16 = vpop.xlane.xlu0 %720 }
 0x378   : > { %1529 = vrcp.f32 %v721_v16 }
 0x385   : > { %v1530_v19 = vpop.eup %1529 }
 0x386   : > { %v735_v20 = vmul.f32 %v1530_v19, %v1522_v58 }
 0x388   : > { %v739_v21 = vpack.c.bf16 %v735_v20, %v735_v20 }
 0x38a   : > { %1390 = vmatmul.mubr.msk.bf16.vlgmr.msra.gmra.mxu1 %vm490_vm2, %v739_v21 }
 0x38b   : > { %1401 = vmatprep.mubr.msk.bf16.mxu1 %vm1666_vm0, %v1665_v0 }
 0x3db   : > { %v724_v22 = vpop.xlane.xlu1 %723 }
 0x3dc   : > { %1531 = vrcp.f32 %v724_v22 }
 0x3df   : > { %v727_v23 = vpop.xlane.xlu0 %726 }
 0x3e0   : > { %1533 = vrcp.f32 %v727_v23 }
 0x3e3   : > { %v730_v24 = vpop.xlane.xlu1 %729  ;;  %v889_v27 = vpop.permute.xlu0 %888 }
 0x3e4   : > { %1535 = vrcp.f32 %v730_v24  ;;  %v894_v30 = vsel %vm748_vm4, %v889_v27, 0  ;;  %v1315_v24 = vld [vmem:[%s2019_s9] ss:$0 sm:$0xff] }
 0x3e7   : > { %v841_v18 = vpop.permute.xlu1 %840 }
 0x3e8   : > { %v846_v25 = vsel %vm748_vm4, %v841_v18, 0 }
 0x3e9   : > { %v1532_v17 = vpop.eup %1531  ;;  %1400 = vmatpush3.bf16.msra.mxu1 %v846_v25 }
 0x3ea   : > { %v736_v26 = vmul.f32 %v1532_v17, %v1524_v10  ;;  %1411 = vmatprep.subr.bf16.mxu1 %v1665_v0  ;;  %v1520_v10 = vld [vmem:[%s2018_s8] sm:$0xff]  }
 0x3ec   : > { %v740_v28 = vpack.c.bf16 %v736_v26, %v736_v26 }
 0x3ed   : > { %v1534_v29 = vpop.eup %1533 }
 0x3ee   : > { %1396 = vmatmul.mubr.msk.bf16.vlgmr.msra.gmra.mxu0 %vm490_vm2, %v740_v28  ;;  %v737_v31 = vmul.f32 %v1534_v29, %v1526_v12 }
 0x3ef   : > { %1406 = vmatpush3.bf16.msra.mxu0 %v894_v30  ;;  %1407 = vmatprep.mubr.msk.bf16.mxu0 %vm1666_vm0, %v1665_v0 }
 0x3f0   : > { %v741_v32 = vpack.c.bf16 %v737_v31, %v737_v31  ;;  %1419 = vmatprep.subr.bf16.mxu0 %v1665_v0 }
 0x3f1   : > { %v1536_v33 = vpop.eup %1535 }
 0x3f2   : > { %1402 = vmatmul.mubr.msk.bf16.vlgmr.msra.gmra.mxu1 %vm490_vm2, %v741_v32  ;;  %v738_v34 = vmul.f32 %v1536_v33, %v1528_v14 }
 0x3f3   : > { %1415 = vmatprep.mubr.msk.bf16.mxu1 %vm1666_vm0, %v1665_v0  ;;  %1412 = vmatpush3.bf16.msra.mxu1 %v1513_v40 }
 0x3f4   : > { %v742_v35 = vpack.c.bf16 %v738_v34, %v738_v34  ;;  %1413 = vmatprep.subr.bf16.mxu1 %v1665_v0 }
 0x3f6   : > { %1408 = vmatmul.mubr.msk.bf16.vlgmr.msra.gmra.mxu0 %vm490_vm2, %v742_v35 }
 0x3f7   : > { %1423 = vmatprep.mubr.msk.bf16.mxu0 %vm1666_vm0, %v1665_v0  ;;  %1414 = vmatpush3.bf16.msra.mxu1 %v1514_v41 }
 0x3f8   : > { %1427 = vmatprep.subr.bf16.mxu1 %v1665_v0  ;;  %1420 = vmatpush3.bf16.msra.mxu0 %v1515_v42 }
 0x3f9   : > { %1421 = vmatprep.subr.bf16.mxu0 %v1665_v0 }
 0x3fc   : > { %1422 = vmatpush3.bf16.msra.mxu0 %v1516_v62 }
 0x44a   : > { %v786_v36 = vpop.f32.mrf.mxu1 }
 0x44c   : > { %v1391_v37 = vpop.f32.mrf.mxu1 }
 0x44e   : > { %v789_v38 = vpop.f32.mrf.mxu1 }
 0x450   : > { %v1392_v39 = vpop.f32.mrf.mxu1 }
 0x4ae   : > { %v834_v43 = vpop.f32.mrf.mxu0 }
 0x4af   : > { %937 = vrot.lane.b32.xlu1 %v834_v43, %s1672_s27 }
 0x4b0   : > { %v1397_v44 = vpop.f32.mrf.mxu0 }
 0x4b2   : > { %v837_v45 = vpop.f32.mrf.mxu0  ;;  %v882_v46 = vpop.f32.mrf.mxu1 }
 0x4b3   : > { %941 = vrot.lane.b32.xlu0 %v882_v46, %s1673_s29 }
 0x4b4   : > { %v1398_v47 = vpop.f32.mrf.mxu0  ;;  %v1403_v48 = vpop.f32.mrf.mxu1 }
 0x4b6   : > { %v885_v49 = vpop.f32.mrf.mxu1  ;;  %v930_v50 = vpop.f32.mrf.mxu0 }
 0x4b7   : > { %945 = vrot.lane.b32.xlu1 %v930_v50, %s1674_s11  ;;  %s1968_s11 = scalar_lea.hbm %s2020_s10, %s1322_s21 }
 0x4b8   : > { %v1404_v51 = vpop.f32.mrf.mxu1  ;;  %v1409_v52 = vpop.f32.mrf.mxu0 }
 0x4ba   : > { %v933_v53 = vpop.f32.mrf.mxu0 }
 0x4bc   : > { %v1410_v54 = vpop.f32.mrf.mxu0 }
 0x521   : > { %v938_v55 = vpop.permute.xlu1 %937 }
 0x522   : > { %v948_v57 = vsel %vm490_vm2, %v786_v36, %v938_v55 }
 0x525   : > { %v942_v56 = vpop.permute.xlu0 %941 }
 0x526   : > { %v950_v58 = vsel %vm949_vm5, %v948_v57, %v942_v56 }
 0x529   : > { %v946_v59 = vpop.permute.xlu1 %945 }
 0x52a   : > { %v952_v60 = vsel %vm951_vm6, %v950_v58, %v946_v59 }
 0x52b   : > { %v953_v61 = vpack.c.bf16 %v952_v60, %v952_v60 }
 0x52d   : > { %1416 = vmatmul.mubr.msk.bf16.vlgmr.msra.gmra.mxu1 %vm429_vm1, %v953_v61 }
 0x52e   : > { %1435 = vmatprep.mubr.msk.bf16.mxu1 %vm1666_vm0, %v1665_v0  ;;  %1428 = vmatpush3.bf16.msra.mxu1 %v1517_v7 }
 0x52f   : > { %1429 = vmatprep.subr.bf16.mxu1 %v1665_v0 }
 0x532   : > { %1430 = vmatpush3.bf16.msra.mxu1 %v1518_v8 }
 0x533   : > { %1431 = vmatprep.subr.bf16.mxu1 %v1665_v0 }
 0x536   : > { %1432 = vmatpush3.bf16.msra.mxu1 %v1519_v9 }
 0x537   : > { %1433 = vmatprep.subr.bf16.mxu1 %v1665_v0 }
 0x53a   : > { %1434 = vmatpush3.bf16.msra.mxu1 %v1520_v10 }
 0x5ed   : > { %v1014_v1 = vpop.f32.mrf.mxu1 }
 0x5ee   : > { %v1015_v2 = vadd.f32 %v1307_v63, %v1014_v1 }
 0x5ef   : > { %v1417_v3 = vpop.f32.mrf.mxu1 }
 0x5f0   : > { %v1020_v4 = vpack.c.bf16 %v1015_v2, %v1015_v2 }
 0x5f1   : > { %v1017_v5 = vpop.f32.mrf.mxu1 }
 0x5f2   : > { %1424 = vmatmul.mubr.msk.bf16.vlgmr.msra.gmra.mxu0 %vm429_vm1, %v1020_v4 }
 0x5f3   : > { %v1418_v6 = vpop.f32.mrf.mxu1 }
 0x6b2   : > { %v1081_v12 = vpop.f32.mrf.mxu0 }
 0x6b3   : > { %v1082_v13 = vadd.f32 %v1311_v11, %v1081_v12 }
 0x6b4   : > { %v1425_v14 = vpop.f32.mrf.mxu0 }
 0x6b5   : > { %v1088_v15 = vmul.f32 0.70710677, %v1082_v13  ;;  %v1087_v0 = vmul.f32 0.5, %v1082_v13 }
 0x6b6   : > { %v1084_v16 = vpop.f32.mrf.mxu0 }
 0x6b7   : > { %1537 = verf.f32 %v1088_v15 }
 0x6b8   : > { %v1426_v19 = vpop.f32.mrf.mxu0 }
 0x6c4   : > { %v1538_v20 = vpop.eup %1537 }
 0x6c5   : > { %v1090_v21 = vadd.f32 1.0, %v1538_v20 }
 0x6c7   : > { %v1091_v22 = vmul.f32 %v1090_v21, %v1087_v0 }
 0x6c9   : > { %v1092_v23 = vpack.c.bf16 %v1091_v22, %v1091_v22 }
 0x6cb   : > { %1436 = vmatmul.mubr.msk.bf16.vlgmr.msra.gmra.mxu1 %vm1132_vm7, %v1092_v23 }
 0x78b   : > { %v1170_v18 = vpop.f32.mrf.mxu1 }
 0x78c   : > { %v1171_v25 = vadd.f32 %v1315_v24, %v1170_v18 }
 0x78d   : > { %v1437_v17 = vpop.f32.mrf.mxu1 }
 0x78e   : > { %1176 = vst.msk [vmem:[%s393_s26] sm:$0xff] %vm429_vm1, %v1171_v25 }
 0x78f   : > { %v1173_v26 = vpop.f32.mrf.mxu1 }
 0x790   : > { %1604 = shalt.err (!%p1601_p3)
}
 0x791   : > { %s1605_s21 = scalar_lea.hbm %s1968_s11, 128  ;;  %s1609_s27 = scalar_lea.hbm %s2020_s10, 256 }
 0x792   : > { %p1606_p2 = scmp.ne.s32.totalorder %s1968_s11, %s1605_s21  ;;  %p1610_p7 = scmp.lt.s32.totalorder %s1968_s11, %s2020_s10 }
 0x793   : > { %p1611_p6 = scmp.lt.s32.totalorder %s1609_s27, %s1605_s21 }
 0x794   : > { %p1607_p4 = pnand %p1606_p2, %p1769_p5 }
 0x795   : > { %p1612_p9 = por %p1611_p6, %p1610_p7 }
 0x796   : > { %p1608_p13 = pneg %p1607_p4 }
 0x798   : > { %p1613_p10 = pnand %p1612_p9, %p1608_p13 }
 0x79a   : > { %1616 = shalt.err (!%p1613_p10)
}
 0x79b   : > { %1447 = dma.vmem_to_hbm [thread:$0]  (%p1769_p5), %s1970_s25, 128, %s1968_s11, %s1178_s28   ;;  %v1438_v27 = vpop.f32.mrf.mxu1 }
 0x79c PF: > { %p1464_p12 = scmp.ge.s32.totalorder %s1659_s16, 2  ;;  %s1203_s17 = sand.u32 1, %s1647_s13  }
 0x79d   : > { %p2030_p8 = scmp.ne.s32.totalorder %s2023_s24, 0  ;;  %s1204_s18 = scalar_lea.sflag [#allocation4], %s1203_s17 }
 0x79f   : > { %p1457_p11 = pnand %p1464_p12, %p2030_p8 }
 0x7a1   : > { %p1458_p0 = pneg %p1457_p11 }
 0x7a3   : > { %1642 = dma.done.wait (%p1458_p0), %s1204_s18, 128  }
 0x7a4   : > { %1644 = vsyncadd (%p1458_p0), %s1204_s18, 4294967168  ;;  %p22_p1 = scmp.ge.s32.totalorder %s1756_s19, 4   ;;  %s2031_s13 = smov %s1651_s14 }
 0x7a5   : > { %s2032_s14 = smov %s1655_s15  ;;  %s2033_s15 = smov %s1767_s22 }
 0x7a6   : > { %s2034_s16 = smov %s1756_s19  ;;  %24 = sbr.rel (!%p22_p1) target bundleno = 5 (0x5), region = 107 }
 0x7ab   :  { %1209 = vsyncpa [#allocation3], 1 }
 0x7ac   :  { %1211 = vsyncpa [#allocation3 + $0x1], 1 }
 0x7ad   :  { %1212 = vsyncpa [#allocation6], 1 }
 0x7ae   :  { %1213 = vsyncpa [#allocation4], 1 }
 0x7af   :  { %1215 = vsyncpa [#allocation4 + $0x1], 1 }

</bundles_post_ra>
